<compile_context>
chip_gen: v7x
topology: tpu7x:2x2x1
jax: 0.10.0
libtpu: 0.0.40
codegen_flags: <defaults>
</compile_context>

<pallas_src>
import functools

import jax
import jax.numpy as jnp
from jax.experimental import pallas as pl
from jax.experimental.pallas import tpu as pltpu


_VMEM_BUDGET = 40 * 1024 * 1024   # working-set target (leaves headroom)
_VMEM_LIMIT = 48 * 1024 * 1024    # scoped VMEM limit; fits every TPU generation


def _round_up(n, m):
    return ((n + m - 1) // m) * m


def _pick_tm(M):
    """Row-tile size: big + MXU aligned, and >=2 blocks when M allows it."""
    Mp16 = _round_up(M, 16)              # bf16 sublane packing
    if Mp16 >= 1024:
        return 512                       # multiple of 256 (MXU), many blocks
    if Mp16 > 256:
        # Split into two row blocks so v7x megacore keeps both TCs busy.
        return _round_up((Mp16 + 1) // 2, 128)
    return Mp16                          # tiny problem: single tile


def _pick_th(Hp, Cp, tm):
    """Hidden-chunk size: full residency if it fits the VMEM budget."""
    def working_set(th):
        return (2 * tm * Cp * 2          # x tile (bf16, double buffered)
                + 2 * Cp * th * 2        # W1 block (bf16, double buffered)
                + 2 * th * Cp * 2        # W2 block (bf16, double buffered)
                + 2 * tm * Cp * 4        # output block (f32, double buffered)
                + 2 * (th + Cp) * 4)     # biases (f32)
    th = Hp
    # Only halve while it stays a 128-multiple divisor of Hp.
    while working_set(th) > _VMEM_BUDGET and th % 256 == 0 and th > 1024:
        th //= 2
    return th


def _ffn_kernel(x_ref, w1_ref, b1_ref, w2_ref, b2_ref, o_ref, *, approx_gelu):
    # x_ref : (tm, Cp) bf16      w1_ref: (Cp, th) bf16   b1_ref: (1, th) f32
    # w2_ref: (th, Cp) bf16      b2_ref: (1, Cp) f32     o_ref : (tm, Cp) f32
    # o_ref's index_map is constant over j, so it stays VMEM-resident across
    # the hidden-dim reduction and doubles as the f32 accumulator.
    j = pl.program_id(1)

    # First matmul (bf16 MXU, f32 accumulate) + bias + GELU in f32.
    h = jnp.dot(x_ref[...], w1_ref[...], preferred_element_type=jnp.float32)
    h = h + b1_ref[...]
    h = jax.nn.gelu(h, approximate=approx_gelu)

    # Second matmul: contribution of this hidden chunk.
    contrib = jnp.dot(h.astype(w2_ref.dtype), w2_ref[...],
                      preferred_element_type=jnp.float32)

    @pl.when(j == 0)
    def _():
        o_ref[...] = contrib

    @pl.when(j > 0)
    def _():
        o_ref[...] += contrib

    @pl.when(j == pl.num_programs(1) - 1)
    def _():
        # Add b2 exactly once, at the end of the reduction.
        o_ref[...] += b2_ref[...]


def prepare_params(w1, b1, w2, b2):
    """Pad to lane-aligned shapes and cast matmul operands to bf16, ONCE.

    Zero padding is exact for this op: padded input channels hit zero rows of
    W1, padded hidden units have zero bias -> gelu(0)=0 -> zero rows of W2,
    and padded output channels are sliced off by the wrapper.
    """
    C, H = w1.shape
    Cp = _round_up(C, 128)
    Hp = _round_up(H, 128)
    w1p = jnp.pad(w1, ((0, Cp - C), (0, Hp - H))).astype(jnp.bfloat16)
    b1p = jnp.pad(b1, (0, Hp - H)).reshape(1, Hp).astype(jnp.float32)
    w2p = jnp.pad(w2, ((0, Hp - H), (0, Cp - C))).astype(jnp.bfloat16)
    b2p = jnp.pad(b2, (0, Cp - C)).reshape(1, Cp).astype(jnp.float32)
    return w1p, b1p, w2p, b2p


@functools.partial(jax.jit, static_argnames=("approx_gelu",))
def feed_forward(x, w1p, b1p, w2p, b2p, *, approx_gelu=True):
    """x: (B, T, C) f32; w1p/b1p/w2p/b2p: outputs of prepare_params."""
    B, T, C = x.shape
    Cp, Hp = w1p.shape
    M = B * T

    tm = _pick_tm(M)
    th = _pick_th(Hp, Cp, tm)
    Mp = _round_up(M, tm)

    # Per-call prep: only x is padded / cast.
    x2d = jnp.pad(x.reshape(M, C).astype(jnp.bfloat16),
                  ((0, Mp - M), (0, Cp - C)))

    grid = (Mp // tm, Hp // th)   # rows (parallel), hidden chunks (reduction)

    cost = pl.CostEstimate(
        flops=4 * Mp * Cp * Hp,              # two matmuls
        transcendentals=Mp * Hp,             # one tanh per hidden activation
        bytes_accessed=(Mp * Cp * 2          # x (bf16)
                        + 2 * Cp * Hp * 2    # W1 + W2 (bf16)
                        + (Hp + Cp) * 4      # biases
                        + Mp * Cp * 4))      # output (f32)

    out2d = pl.pallas_call(
        functools.partial(_ffn_kernel, approx_gelu=approx_gelu),
        out_shape=jax.ShapeDtypeStruct((Mp, Cp), jnp.float32),
        grid_spec=pltpu.PrefetchScalarGridSpec(
            num_scalar_prefetch=0,
            grid=grid,
            in_specs=[
                pl.BlockSpec((tm, Cp), lambda i, j: (i, 0)),   # x rows
                pl.BlockSpec((Cp, th), lambda i, j: (0, j)),   # W1 chunk
                pl.BlockSpec((1, th), lambda i, j: (0, j)),    # b1 chunk
                pl.BlockSpec((th, Cp), lambda i, j: (j, 0)),   # W2 chunk
                pl.BlockSpec((1, Cp), lambda i, j: (0, 0)),    # b2 (full)
            ],
            out_specs=pl.BlockSpec((tm, Cp), lambda i, j: (i, 0)),
        ),
        compiler_params=pltpu.CompilerParams(
            dimension_semantics=("parallel", "arbitrary"),
            vmem_limit_bytes=_VMEM_LIMIT),
        cost_estimate=cost,
    )(x2d, w1p, b1p, w2p, b2p)

    return out2d[:M, :C].reshape(B, T, C).astype(x.dtype)


def init_params(key, n_embd):
    """Deterministic init mimicking nn.Linear's U(-1/sqrt(fan_in), 1/sqrt(fan_in))."""
    hidden = 4 * n_embd
    k1, k2, k3, k4 = jax.random.split(key, 4)
    lim1 = 1.0 / jnp.sqrt(n_embd)
    lim2 = 1.0 / jnp.sqrt(hidden)
    # Weights stored already transposed to (in, out) for x @ W.
    w1 = jax.random.uniform(k1, (n_embd, hidden), jnp.float32, -lim1, lim1)
    b1 = jax.random.uniform(k2, (hidden,), jnp.float32, -lim1, lim1)
    w2 = jax.random.uniform(k3, (hidden, n_embd), jnp.float32, -lim2, lim2)
    b2 = jax.random.uniform(k4, (n_embd,), jnp.float32, -lim2, lim2)
    return w1, b1, w2, b2


if __name__ == "__main__":
    key = jax.random.PRNGKey(0)
    kx, kp = jax.random.split(key)

    B, T, n_embd = 2, 8, 32          # small shapes: batch=2, seq=8, n_embd=32
    x = jax.random.normal(kx, (B, T, n_embd), jnp.float32)
    w1, b1, w2, b2 = init_params(kp, n_embd)

    # Pad/cast weights once (hoisted out of the per-call path).
    params = prepare_params(w1, b1, w2, b2)

    out = feed_forward(x, *params)
    out = jax.block_until_ready(out)
    assert out.shape == (B, T, n_embd)

    # Reference with the same bf16-matmul / f32-accumulate / tanh-GELU math.
    xb = x.reshape(-1, n_embd).astype(jnp.bfloat16)
    h = jnp.dot(xb, w1.astype(jnp.bfloat16),
                preferred_element_type=jnp.float32) + b1
    h = jax.nn.gelu(h, approximate=True)
    ref_bf16 = (jnp.dot(h.astype(jnp.bfloat16), w2.astype(jnp.bfloat16),
                        preferred_element_type=jnp.float32) + b2)
    ref_bf16 = ref_bf16.reshape(B, T, n_embd)
    assert jnp.allclose(out, ref_bf16, atol=2e-3, rtol=2e-3)

    # Loose sanity check against full-f32 math (bf16 drift only).
    hf = jax.nn.gelu(x.reshape(-1, n_embd) @ w1 + b1, approximate=True)
    ref_f32 = (hf @ w2 + b2).reshape(B, T, n_embd)
    assert jnp.allclose(out, ref_f32, atol=5e-2, rtol=5e-2)

    print("KERNEL_OK")
</pallas_src>

<mosaic_0001>
module attributes {stable_mosaic.version = 11 : i64} {
  func.func @_ffn_kernel(%arg0: i32, %arg1: i32, %arg2: memref<16x128xbf16, #tpu.memory_space<vmem>>, %arg3: memref<128x128xbf16, #tpu.memory_space<vmem>>, %arg4: memref<1x128xf32, #tpu.memory_space<vmem>>, %arg5: memref<128x128xbf16, #tpu.memory_space<vmem>>, %arg6: memref<1x128xf32, #tpu.memory_space<vmem>>, %arg7: memref<16x128xf32, #tpu.memory_space<vmem>>) attributes {dimension_semantics = [#tpu.dimension_semantics<parallel>, #tpu.dimension_semantics<arbitrary>], iteration_bounds = array<i64: 1, 1>, scalar_prefetch = 0 : i64, scratch_operands = 0 : i64, tpu.core_type = #tpu.core_type<tc>, window_params = [{transform_indices = @transform_0, window_bounds = array<i64: 16, 128>}, {transform_indices = @transform_1, window_bounds = array<i64: 128, 128>}, {transform_indices = @transform_2, window_bounds = array<i64: 1, 128>}, {transform_indices = @transform_3, window_bounds = array<i64: 128, 128>}, {pipeline_mode = #tpu.pipeline_mode<synchronous>, transform_indices = @transform_4, window_bounds = array<i64: 1, 128>}, {transform_indices = @transform_5, window_bounds = array<i64: 16, 128>}]} {
    %c0 = arith.constant 0 : index
    %c0_0 = arith.constant 0 : index
    %0 = vector.load %arg2[%c0, %c0_0] : memref<16x128xbf16, #tpu.memory_space<vmem>>, vector<16x128xbf16>
    %c0_1 = arith.constant 0 : index
    %c0_2 = arith.constant 0 : index
    %1 = vector.load %arg3[%c0_1, %c0_2] : memref<128x128xbf16, #tpu.memory_space<vmem>>, vector<128x128xbf16>
    %cst = arith.constant dense<0.000000e+00> : vector<16x128xf32>
    %2 = tpu.matmul %0, %1, %cst {dimension_numbers = #tpu.dot_dimension_numbers<[1], [0], [0], [1], [0, 0, 1, 1], [], []>} : vector<16x128xbf16>, vector<128x128xbf16>, vector<16x128xf32> -> vector<16x128xf32>
    %c0_3 = arith.constant 0 : index
    %c0_4 = arith.constant 0 : index
    %3 = vector.load %arg4[%c0_3, %c0_4] : memref<1x128xf32, #tpu.memory_space<vmem>>, vector<1x128xf32>
    %4 = vector.broadcast %3 : vector<1x128xf32> to vector<16x128xf32>
    %5 = arith.addf %2, %4 : vector<16x128xf32>
    %6 = arith.mulf %5, %5 : vector<16x128xf32>
    %7 = arith.mulf %5, %6 : vector<16x128xf32>
    %cst_5 = arith.constant 4.471500e-02 : f32
    %8 = vector.broadcast %cst_5 : f32 to vector<16x128xf32>
    %9 = arith.mulf %8, %7 : vector<16x128xf32>
    %10 = arith.addf %5, %9 : vector<16x128xf32>
    %cst_6 = arith.constant 0.797884583 : f32
    %11 = vector.broadcast %cst_6 : f32 to vector<16x128xf32>
    %12 = arith.mulf %11, %10 : vector<16x128xf32>
    %13 = math.tanh %12 : vector<16x128xf32>
    %cst_7 = arith.constant 1.000000e+00 : f32
    %14 = vector.broadcast %cst_7 : f32 to vector<16x128xf32>
    %15 = arith.addf %14, %13 : vector<16x128xf32>
    %cst_8 = arith.constant 5.000000e-01 : f32
    %16 = vector.broadcast %cst_8 : f32 to vector<16x128xf32>
    %17 = arith.mulf %16, %15 : vector<16x128xf32>
    %18 = arith.mulf %5, %17 : vector<16x128xf32>
    %19 = arith.truncf %18 : vector<16x128xf32> to vector<16x128xbf16>
    %c0_9 = arith.constant 0 : index
    %c0_10 = arith.constant 0 : index
    %20 = vector.load %arg5[%c0_9, %c0_10] : memref<128x128xbf16, #tpu.memory_space<vmem>>, vector<128x128xbf16>
    %cst_11 = arith.constant dense<0.000000e+00> : vector<16x128xf32>
    %21 = tpu.matmul %19, %20, %cst_11 {dimension_numbers = #tpu.dot_dimension_numbers<[1], [0], [0], [1], [0, 0, 1, 1], [], []>} : vector<16x128xbf16>, vector<128x128xbf16>, vector<16x128xf32> -> vector<16x128xf32>
    %c0_i32 = arith.constant 0 : i32
    %22 = arith.cmpi eq, %arg1, %c0_i32 : i32
    %23 = arith.extui %22 : i1 to i32
    %c0_i32_12 = arith.constant 0 : i32
    %24 = arith.cmpi ne, %23, %c0_i32_12 : i32
    scf.if %24 {
      %c0_17 = arith.constant 0 : index
      %c0_18 = arith.constant 0 : index
      %31 = vector.load %arg7[%c0_17, %c0_18] : memref<16x128xf32, #tpu.memory_space<vmem>>, vector<16x128xf32>
      tpu.vector_store %arg7[%c0_17, %c0_18], %21 {strides = array<i32>} : memref<16x128xf32, #tpu.memory_space<vmem>>, vector<16x128xf32>,
    } else {
    }
    %c0_i32_13 = arith.constant 0 : i32
    %25 = arith.cmpi sgt, %arg1, %c0_i32_13 : i32
    %26 = arith.extui %25 : i1 to i32
    %c0_i32_14 = arith.constant 0 : i32
    %27 = arith.cmpi ne, %26, %c0_i32_14 : i32
    scf.if %27 {
      %c0_17 = arith.constant 0 : index
      %c0_18 = arith.constant 0 : index
      %31 = vector.load %arg7[%c0_17, %c0_18] : memref<16x128xf32, #tpu.memory_space<vmem>>, vector<16x128xf32>
      %32 = arith.addf %31, %21 : vector<16x128xf32>
      %c0_19 = arith.constant 0 : index
      %c0_20 = arith.constant 0 : index
      %33 = vector.load %arg7[%c0_19, %c0_20] : memref<16x128xf32, #tpu.memory_space<vmem>>, vector<16x128xf32>
      tpu.vector_store %arg7[%c0_19, %c0_20], %32 {strides = array<i32>} : memref<16x128xf32, #tpu.memory_space<vmem>>, vector<16x128xf32>,
    } else {
    }
    %c0_i32_15 = arith.constant 0 : i32
    %28 = arith.cmpi eq, %arg1, %c0_i32_15 : i32
    %29 = arith.extui %28 : i1 to i32
    %c0_i32_16 = arith.constant 0 : i32
    %30 = arith.cmpi ne, %29, %c0_i32_16 : i32
    scf.if %30 {
      %c0_17 = arith.constant 0 : index
      %c0_18 = arith.constant 0 : index
      %31 = vector.load %arg7[%c0_17, %c0_18] : memref<16x128xf32, #tpu.memory_space<vmem>>, vector<16x128xf32>
      %c0_19 = arith.constant 0 : index
      %c0_20 = arith.constant 0 : index
      %32 = vector.load %arg6[%c0_19, %c0_20] : memref<1x128xf32, #tpu.memory_space<vmem>>, vector<1x128xf32>
      %33 = vector.broadcast %32 : vector<1x128xf32> to vector<16x128xf32>
      %34 = arith.addf %31, %33 : vector<16x128xf32>
      %c0_21 = arith.constant 0 : index
      %c0_22 = arith.constant 0 : index
      %35 = vector.load %arg7[%c0_21, %c0_22] : memref<16x128xf32, #tpu.memory_space<vmem>>, vector<16x128xf32>
      tpu.vector_store %arg7[%c0_21, %c0_22], %34 {strides = array<i32>} : memref<16x128xf32, #tpu.memory_space<vmem>>, vector<16x128xf32>,
    } else {
    }
    return
  }
  func.func @transform_0(%arg0: i32, %arg1: i32) -> (i32, i32) {
    %c0_i32 = arith.constant 0 : i32
    %c0_i32_0 = arith.constant 0 : i32
    return %arg0, %c0_i32 : i32, i32
  }
  func.func @transform_1(%arg0: i32, %arg1: i32) -> (i32, i32) {
    %c0_i32 = arith.constant 0 : i32
    %c0_i32_0 = arith.constant 0 : i32
    return %c0_i32, %arg1 : i32, i32
  }
  func.func @transform_2(%arg0: i32, %arg1: i32) -> (i32, i32) {
    %c0_i32 = arith.constant 0 : i32
    %c0_i32_0 = arith.constant 0 : i32
    return %c0_i32, %arg1 : i32, i32
  }
  func.func @transform_3(%arg0: i32, %arg1: i32) -> (i32, i32) {
    %c0_i32 = arith.constant 0 : i32
    %c0_i32_0 = arith.constant 0 : i32
    return %arg1, %c0_i32 : i32, i32
  }
  func.func @transform_4(%arg0: i32, %arg1: i32) -> (i32, i32) {
    %c0_i32 = arith.constant 0 : i32
    %c0_i32_0 = arith.constant 0 : i32
    %c0_i32_1 = arith.constant 0 : i32
    return %c0_i32, %c0_i32_0 : i32, i32
  }
  func.func @transform_5(%arg0: i32, %arg1: i32) -> (i32, i32) {
    %c0_i32 = arith.constant 0 : i32
    %c0_i32_0 = arith.constant 0 : i32
    return %arg0, %c0_i32 : i32, i32
  }
}

</mosaic_0001>

<bundles_post_ra>
// kernel: feed_forward.1
= control target key start
LH: loop header
LB: loop body
LE: loop exit
PB: predicated region body
PF: predicated region fallthrough
CT: control target
= control target key end

     0   :  { %10 = vsyncpa [#allocation3], 0  ;;  %s558_s0 = inlined_call_operand.vmem [shape: bf16[16,128], index: 0, kind: input, shape index: {}]   ;;  %s559_s1 = inlined_call_operand.hbm [shape: bf16[128,128], index: 1, kind: input, shape index: {}]   ;;  %s560_s2 = inlined_call_operand.vmem [shape: f32[1,128], index: 2, kind: input, shape index: {}]   ;;  %s561_s3 = inlined_call_operand.hbm [shape: bf16[128,128], index: 3, kind: input, shape index: {}]   ;;  %s562_s4 = inlined_call_operand.vmem [shape: f32[1,128], index: 4, kind: input, shape index: {}]   ;;  %s563_s5 = inlined_call_operand.vmem [shape: f32[16,128], index: 5, kind: output, shape index: {}]  }
   0x1   :  { %11 = vsyncpa [#allocation5], 0  ;;  %s483_s18 = smov [#allocation2]   ;;  %s435_s22 = scalar_lea.hbm %s559_s1, 1024 }
   0x2   :  { %s19_s19 = sshll.u32 %s483_s18, 4  ;;  %p436_p0 = scmp.ne.s32.totalorder %s559_s1, %s435_s22  ;;  %s20_s19 = int_to_ptr.vmem [resolvable:$true] %s19_s19 }
   0x3   :  { %p439_p1 = scmp.lt.u32.totalorder %s435_s22, %s559_s1 }
   0x5   :  { %p441_p2 = pnand %p439_p1, %p436_p0 }
   0x7   :  { %444 = shalt.err (!%p441_p2)
}
   0x8   :  { %s445_s27 = scalar_lea.vmem %s20_s19, 1024  ;;  %p450_p4 = scmp.lt.s32.totalorder %s20_s19, %s20_s19 }
   0x9   :  { %p446_p3 = scmp.ne.s32.totalorder %s20_s19, %s445_s27  ;;  %p451_p5 = scmp.lt.s32.totalorder %s445_s27, %s445_s27 }
   0xb   :  { %p452_p6 = por %p451_p5, %p450_p4 }
   0xd   :  { %p453_p7 = pnand %p452_p6, %p446_p3 }
   0xf   :  { %456 = shalt.err (!%p453_p7)
}
  0x10   :  { %s484_s28 = smov 64   ;;  %s485_s29 = smov 4  }
  0x11   :  { %25 = dma.hbm_to_vmem [thread:$0]  %s559_s1, 1024, %s20_s19, [#allocation3], %s484_s28, %s484_s28, %s485_s29  }
  0x12   :  { %s486_s7 = smov [#allocation4]   ;;  %s457_s11 = scalar_lea.hbm %s561_s3, 1024 }
  0x13   :  { %s33_s8 = sshll.u32 %s486_s7, 4  ;;  %p458_p8 = scmp.ne.s32.totalorder %s561_s3, %s457_s11  ;;  %s34_s8 = int_to_ptr.vmem [resolvable:$true] %s33_s8 }
  0x14   :  { %p461_p9 = scmp.lt.u32.totalorder %s457_s11, %s561_s3 }
  0x16   :  { %p463_p10 = pnand %p461_p9, %p458_p8 }
  0x18   :  { %466 = shalt.err (!%p463_p10)
}
  0x19   :  { %s467_s16 = scalar_lea.vmem %s34_s8, 1024  ;;  %p472_p12 = scmp.lt.s32.totalorder %s34_s8, %s34_s8 }
  0x1a   :  { %p468_p11 = scmp.ne.s32.totalorder %s34_s8, %s467_s16  ;;  %p473_p13 = scmp.lt.s32.totalorder %s467_s16, %s467_s16 }
  0x1c   :  { %p474_p0 = por %p473_p13, %p472_p12 }
  0x1e   :  { %p475_p1 = pnand %p474_p0, %p468_p11 }
  0x20   :  { %478 = shalt.err (!%p475_p1)
}
  0x21   :  { %39 = dma.hbm_to_vmem [thread:$0]  %s561_s3, 1024, %s34_s8, [#allocation5], %s484_s28, %s484_s28, %s485_s29  }
  0x22   :  { %479 = dma.done.wait [#allocation3], 1024  }
  0x23   :  { %480 = vsyncadd [#allocation3], 4294966272 }
  0x24   :  { %481 = dma.done.wait [#allocation5], 1024  }
  0x25   :  { %482 = vsyncadd [#allocation5], 4294966272  ;;  %v487_v0 = vmov 0.0   ;;  %vm488_vm0 = vmmov 0   ;;  %v414_v1 = vld [vmem:[#allocation2] sm:$0xff]   ;;  %v415_v2 = vld [vmem:[#allocation2 + $0x8] sm:$0xff]  }
  0x26   :  { %368 = vmatprep.subr.bf16.mxu0 %v487_v0  ;;  %384 = vmatprep.mubr.msk.bf16.mxu0 %vm488_vm0, %v487_v0  ;;  %v416_v3 = vld [vmem:[#allocation2 + $0x10] sm:$0xff]   ;;  %v417_v4 = vld [vmem:[#allocation2 + $0x18] sm:$0xff]   ;;  %v418_v5 = vld [vmem:[#allocation2 + $0x20] sm:$0xff]  }
  0x27   :  { %388 = vmatprep.subr.bf16.mxu1 %v487_v0  ;;  %404 = vmatprep.mubr.msk.bf16.mxu1 %vm488_vm0, %v487_v0  ;;  %v419_v6 = vld [vmem:[#allocation2 + $0x28] sm:$0xff]   ;;  %v420_v7 = vld [vmem:[#allocation2 + $0x30] sm:$0xff]   ;;  %v421_v8 = vld [vmem:[#allocation2 + $0x38] sm:$0xff]  }
  0x28   :  { %369 = vmatpush3.bf16.msra.mxu0 %v414_v1  ;;  %v422_v9 = vld [vmem:[%s558_s0] sm:$0xff]   ;;  %v424_v11 = vld [vmem:[#allocation4 + $0x8] sm:$0xff]   ;;  %v425_v12 = vld [vmem:[#allocation4 + $0x10] sm:$0xff]  }
  0x29   :  { %370 = vmatprep.subr.bf16.mxu0 %v487_v0  ;;  %v423_v10 = vld [vmem:[#allocation4] sm:$0xff]   ;;  %v426_v13 = vld [vmem:[#allocation4 + $0x18] sm:$0xff]   ;;  %v428_v15 = vld [vmem:[#allocation4 + $0x28] sm:$0xff]  }
  0x2a   :  { %389 = vmatpush3.bf16.msra.mxu1 %v423_v10  ;;  %v427_v14 = vld [vmem:[#allocation4 + $0x20] sm:$0xff]   ;;  %v429_v16 = vld [vmem:[#allocation4 + $0x30] sm:$0xff]   ;;  %v430_v17 = vld [vmem:[#allocation4 + $0x38] sm:$0xff]  }
  0x2b   :  { %390 = vmatprep.subr.bf16.mxu1 %v487_v0  ;;  %v331_v18 = vld [vmem:[%s560_s2] ss:$0 sm:$0xff] }
  0x2c   :  { %371 = vmatpush3.bf16.msra.mxu0 %v415_v2  ;;  %v349_v44 = vld [vmem:[%s562_s4] ss:$0 sm:$0xff] }
  0x2d   :  { %372 = vmatprep.subr.bf16.mxu0 %v487_v0 }
  0x2e   :  { %391 = vmatpush3.bf16.msra.mxu1 %v424_v11 }
  0x2f   :  { %392 = vmatprep.subr.bf16.mxu1 %v487_v0 }
  0x30   :  { %373 = vmatpush3.bf16.msra.mxu0 %v416_v3 }
  0x31   :  { %374 = vmatprep.subr.bf16.mxu0 %v487_v0 }
  0x32   :  { %393 = vmatpush3.bf16.msra.mxu1 %v425_v12 }
  0x33   :  { %394 = vmatprep.subr.bf16.mxu1 %v487_v0 }
  0x34   :  { %375 = vmatpush3.bf16.msra.mxu0 %v417_v4 }
  0x35   :  { %376 = vmatprep.subr.bf16.mxu0 %v487_v0 }
  0x36   :  { %395 = vmatpush3.bf16.msra.mxu1 %v426_v13 }
  0x37   :  { %396 = vmatprep.subr.bf16.mxu1 %v487_v0 }
  0x38   :  { %377 = vmatpush3.bf16.msra.mxu0 %v418_v5 }
  0x39   :  { %378 = vmatprep.subr.bf16.mxu0 %v487_v0 }
  0x3a   :  { %397 = vmatpush3.bf16.msra.mxu1 %v427_v14 }
  0x3b   :  { %398 = vmatprep.subr.bf16.mxu1 %v487_v0 }
  0x3c   :  { %379 = vmatpush3.bf16.msra.mxu0 %v419_v6 }
  0x3d   :  { %380 = vmatprep.subr.bf16.mxu0 %v487_v0 }
  0x3e   :  { %399 = vmatpush3.bf16.msra.mxu1 %v428_v15 }
  0x3f   :  { %400 = vmatprep.subr.bf16.mxu1 %v487_v0 }
  0x40   :  { %381 = vmatpush3.bf16.msra.mxu0 %v420_v7 }
  0x41   :  { %382 = vmatprep.subr.bf16.mxu0 %v487_v0 }
  0x42   :  { %401 = vmatpush3.bf16.msra.mxu1 %v429_v16 }
  0x43   :  { %402 = vmatprep.subr.bf16.mxu1 %v487_v0 }
  0x44   :  { %383 = vmatpush3.bf16.msra.mxu0 %v421_v8 }
  0x46   :  { %403 = vmatpush3.bf16.msra.mxu1 %v430_v17 }
  0x47   :  { %385 = vmatmul.mubr.bf16.vlgmr.msra.gmra.mrb[0].mxu0 %v422_v9 }
 0x11a   :  { %v162_v19 = vpop.f32.mrb[0].mxu0 }
 0x11b   :  { %v163_v20 = vadd.f32 %v331_v18, %v162_v19  ;;  %v386_v21 = vpop.f32.mrb[1].mxu0 }
 0x11c   :  { %v165_v22 = vpop.f32.mrb[2].mxu0 }
 0x11d   :  { %v169_v23 = vmul.f32 %v163_v20, %v163_v20  ;;  %v166_v24 = vadd.f32 %v331_v18, %v165_v22  ;;  %v387_v25 = vpop.f32.mrb[3].mxu0 }
 0x11f   :  { %v171_v26 = vmul.f32 %v169_v23, %v163_v20  ;;  %v170_v27 = vmul.f32 %v166_v24, %v166_v24 }
 0x121   :  { %v173_v28 = vmul.f32 0.044715, %v171_v26  ;;  %v172_v29 = vmul.f32 %v170_v27, %v166_v24 }
 0x123   :  { %v175_v30 = vadd.f32 %v173_v28, %v163_v20  ;;  %v174_v31 = vmul.f32 0.044715, %v172_v29 }
 0x125   :  { %v177_v32 = vmul.f32 0.7978846, %v175_v30  ;;  %v176_v33 = vadd.f32 %v174_v31, %v166_v24 }
 0x127   :  { %431 = vtanh.f32 %v177_v32  ;;  %v178_v34 = vmul.f32 0.7978846, %v176_v33 }
 0x129   :  { %433 = vtanh.f32 %v178_v34 }
 0x131   :  { %v432_v35 = vpop.eup %431 }
 0x132   :  { %v181_v36 = vadd.f32 1.0, %v432_v35 }
 0x133   :  { %v434_v37 = vpop.eup %433 }
 0x134   :  { %v182_v38 = vadd.f32 1.0, %v434_v37  ;;  %v183_v39 = vmul.f32 0.5, %v181_v36 }
 0x136   :  { %v184_v40 = vmul.f32 0.5, %v182_v38  ;;  %v185_v41 = vmul.f32 %v183_v39, %v163_v20 }
 0x138   :  { %v186_v42 = vmul.f32 %v184_v40, %v166_v24 }
 0x13a   :  { %v187_v43 = vpack.c.bf16 %v186_v42, %v185_v41 }
 0x13c   :  { %405 = vmatmul.mubr.bf16.vlgmr.msra.gmra.mrb[0].mxu1 %v187_v43 }
 0x20f   :  { %v286_v45 = vpop.f32.mrb[0].mxu1 }
 0x210   :  { %v321_v46 = vadd.f32 %v349_v44, %v286_v45  ;;  %v406_v47 = vpop.f32.mrb[1].mxu1 }
 0x211   :  { %v289_v48 = vpop.f32.mrb[2].mxu1 }
 0x212   :  { %323 = vst [vmem:[%s563_s5] sm:$0xff] %v321_v46  ;;  %v322_v49 = vadd.f32 %v349_v44, %v289_v48  ;;  %v407_v50 = vpop.f32.mrb[3].mxu1 }
 0x214   :  { %324 = vst [vmem:[%s563_s5 + $0x8] sm:$0xff] %v322_v49 }
 0x215   :  { %329 = vsyncpa [#allocation3], 1 }
 0x216   :  { %330 = vsyncpa [#allocation5], 1 }

</bundles_post_ra>
